<compile_context>
chip_gen: v7x
topology: tpu7x:2x2x1
jax: 0.10.0
libtpu: 0.0.40
codegen_flags: <defaults>
</compile_context>

<pallas_src>
import functools
import math

import jax
import jax.numpy as jnp
from jax.experimental import pallas as pl
from jax.experimental.pallas import tpu as pltpu


_LANE = 128          # TPU lane width (last dim of a vreg)
_SUBLANE = 8         # TPU sublane count (f32)
_SQRT2 = 2.0 ** 0.5


def _round_up(x, m):
    return (x + m - 1) // m * m


def _chip_profile():
    """Best-effort TPU generation detection.

    Returns (tensorcores_per_chip, vmem_bytes, max_batch_tile_rows).
    """
    kind = ""
    try:
        kind = jax.devices()[0].device_kind.lower()
    except Exception:
        pass
    if "v7" in kind:
        cores, vmem, max_block = 2, 64 << 20, 512     # 2 TCs, 64 MiB VMEM/TC
    elif "v6" in kind:
        cores, vmem, max_block = 1, 128 << 20, 2048   # 1 TC, 128 MiB VMEM
    elif "v5" in kind:
        cores, vmem, max_block = 1, 128 << 20, 2048   # 1 TC, 128 MiB VMEM
    else:
        cores, vmem, max_block = 1, 64 << 20, 512     # conservative default
    try:
        info_vmem = getattr(pltpu.get_tpu_info(), "vmem_capacity_bytes", None)
        if info_vmem:
            vmem = int(info_vmem)
    except Exception:
        pass
    return cores, vmem, max_block


def _mapper_kernel(x_ref, *refs, true_d_in):
    """refs = (w0, b0, w1, b1, ..., w{L-1}, b{L-1}, o_ref).

    x_ref : (block_b, D_in_pad)   f32   (padded lanes are zero)
    w_i   : (D_in_pad, D_out_pad) bf16  (pre-scaled, pre-transposed, zero-padded)
    b_i   : (1, D_out_pad)        f32   (pre-scaled by lr_mul, zero-padded)
    """
    o_ref = refs[-1]
    wb_refs = refs[:-1]
    num_layers = len(wb_refs) // 2

    x = x_ref[...].astype(jnp.float32)

    # PixelNorm over the *true* feature width.  Padded lanes are zero so the
    # sum of squares is unaffected; divide by the real D, not the padded one.
    ssq = jnp.sum(x * x, axis=-1, keepdims=True)
    h = x * jax.lax.rsqrt(ssq * jnp.float32(1.0 / true_d_in) + jnp.float32(1e-8))

    pos = jnp.float32(_SQRT2)        # sqrt(2) gain folded into the select
    neg = jnp.float32(0.2 * _SQRT2)

    for li in range(num_layers):
        w = wb_refs[2 * li][...]                     # bf16 (D_in_pad, D_out_pad)
        b = wb_refs[2 * li + 1][...]                 # f32  (1, D_out_pad)
        # bf16 MXU operands, f32 accumulation; bias added in f32.
        y = jnp.dot(h.astype(jnp.bfloat16), w,
                    preferred_element_type=jnp.float32) + b
        # leaky_relu(y, 0.2) * sqrt(2) with a single multiply.
        a = y * jnp.where(y >= 0.0, pos, neg)
        # Intermediate activations stay bf16 (the next dot needs bf16 anyway;
        # this just moves the cast and halves the intermediate footprint).
        h = a.astype(jnp.bfloat16) if li + 1 < num_layers else a

    o_ref[...] = h.astype(o_ref.dtype)


def init_mapper_params(key, in_channel, out_channel, num_layers, lr_mul=0.01):
    """Synthetic params matching EqualLinear's shapes/semantics (f32, unpadded).

    Raw torch params:  weight ~ randn(out, in) / lr_mul,  bias ~ randn(out).
    Effective params used in forward:
        w_eff = (weight * (1/sqrt(in)) * lr_mul).T   -> (in, out)
        b_eff = bias * lr_mul                        -> (1, out)
    """
    params = []
    dims = [in_channel] + [out_channel] * num_layers
    for i in range(num_layers):
        d_in, d_out = dims[i], dims[i + 1]
        key, kw, kb = jax.random.split(key, 3)
        w_raw = jax.random.normal(kw, (d_out, d_in), dtype=jnp.float32) / lr_mul
        b_raw = jax.random.normal(kb, (d_out,), dtype=jnp.float32)
        scale = (1.0 / math.sqrt(d_in)) * lr_mul
        w_eff = (w_raw * scale).T                       # (d_in, d_out), f32
        b_eff = (b_raw * lr_mul).reshape(1, d_out)      # (1, d_out),   f32
        params.append((w_eff, b_eff))
    return params


def prepare_mapper_params(params):
    """One-time packing: pad feature dims to 128 lanes, cast weights to bf16.

    Do this once at load time and reuse the result across forward calls, so
    the per-call HBM traffic is only the single kernel read of the weights.
    """
    d_in = params[0][0].shape[0]
    d_in_p = _round_up(d_in, _LANE)
    weights, biases = [], []
    prev, prev_p = d_in, d_in_p
    for (w_eff, b_eff) in params:
        di, do = w_eff.shape
        assert di == prev, "layer input dim mismatch"
        do_p = _round_up(do, _LANE)
        wp = jnp.zeros((prev_p, do_p), jnp.float32).at[:di, :do].set(w_eff)
        bp = jnp.zeros((1, do_p), jnp.float32).at[:, :do].set(
            jnp.reshape(b_eff, (1, do)))
        weights.append(wp.astype(jnp.bfloat16))   # bf16 MXU operand, half DMA
        biases.append(bp)                         # f32 bias (added post-accum)
        prev, prev_p = do, do_p
    return {
        "weights": weights, "biases": biases,
        "d_in": d_in, "d_in_p": d_in_p,
        "d_out": prev, "d_out_p": prev_p,
    }


def mapper_forward(x, packed, *, block_b=None):
    """Whole Mapper forward in one Pallas kernel, tiled over the batch axis.

    `packed` must come from prepare_mapper_params (pre-padded / pre-cast).
    """
    B, d_in = x.shape
    assert d_in == packed["d_in"], "input feature dim mismatch"
    d_in_p = packed["d_in_p"]
    d_out, d_out_p = packed["d_out"], packed["d_out_p"]
    weights, biases = packed["weights"], packed["biases"]

    cores, vmem_bytes, max_block = _chip_profile()
    out_itemsize = jnp.dtype(x.dtype).itemsize
    max_d_p = max([d_in_p] + [int(w.shape[1]) for w in weights])

    weight_bytes = sum(int(w.size) * 2 for w in weights)    # bf16
    bias_bytes = sum(int(b.size) * 4 for b in biases)       # f32
    # Single-buffer the constant-index weight/bias specs only when the
    # double-buffer copy would cost meaningful VMEM; tiny-weight configs keep
    # the default (known-good) pipelining path.
    single_buffer_weights = weight_bytes > (8 << 20)
    wb_copies = 1 if single_buffer_weights else 2
    fixed_bytes = (weight_bytes + bias_bytes) * wb_copies

    # Per-batch-row VMEM that scales with block_b: double-buffered x and out
    # tiles plus ~2 f32 activation slabs of the widest layer.
    per_row_bytes = (d_in_p * 4 * 2
                     + d_out_p * out_itemsize * 2
                     + 2 * max_d_p * 4)

    # ---- batch tiling policy ------------------------------------------------
    b_p = _round_up(B, _SUBLANE)
    if block_b is None:
        block_b = min(b_p, max_block)
        # Split only on multi-TC chips (v7x) and only when each per-TC tile
        # carries >= 256 rows of MXU work; otherwise extra grid steps are pure
        # overhead (the weights get DMA'd into each core's VMEM anyway).
        if cores >= 2 and b_p >= 2 * 256:
            per_core = _round_up(pl.cdiv(b_p, cores), _SUBLANE)
            block_b = min(block_b, max(per_core, 256))
    else:
        # Caller-supplied tile: force sublane alignment and clamp to batch.
        block_b = max(_SUBLANE, (int(block_b) // _SUBLANE) * _SUBLANE)
        block_b = min(block_b, b_p)

    # Clamp block_b so all buffers fit ~80% of VMEM (headroom for scratch).
    budget = int(vmem_bytes * 0.8) - fixed_bytes
    if budget > 0:
        max_rows = max(_SUBLANE, (budget // per_row_bytes) // _SUBLANE * _SUBLANE)
        block_b = min(block_b, max_rows)
    block_b = max(_SUBLANE, block_b)

    b_p = _round_up(b_p, block_b)
    grid_b = b_p // block_b

    # Size the scoped-VMEM limit from the actual footprint, not a blanket 48MiB.
    vmem_limit = int((fixed_bytes + block_b * per_row_bytes) * 1.25) + (2 << 20)
    vmem_limit = max(16 << 20, min(vmem_limit, int(vmem_bytes)))

    # ---- pad input (no-op when already aligned) -----------------------------
    xp = x
    if (b_p, d_in_p) != (B, d_in):
        xp = jnp.zeros((b_p, d_in_p), x.dtype).at[:B, :d_in].set(x)

    def build_call(single_wb):
        in_specs = [pl.BlockSpec((block_b, d_in_p), lambda i: (i, 0))]
        args = [xp]
        prev_p = d_in_p
        for w, b in zip(weights, biases):
            do_p = int(w.shape[1])
            if single_wb:
                w_spec = pl.BlockSpec((prev_p, do_p), lambda i: (0, 0),
                                      pipeline_mode=pl.Buffered(1))
                b_spec = pl.BlockSpec((1, do_p), lambda i: (0, 0),
                                      pipeline_mode=pl.Buffered(1))
            else:
                w_spec = pl.BlockSpec((prev_p, do_p), lambda i: (0, 0))
                b_spec = pl.BlockSpec((1, do_p), lambda i: (0, 0))
            in_specs += [w_spec, b_spec]
            args += [w, b]
            prev_p = do_p
        call = pl.pallas_call(
            functools.partial(_mapper_kernel, true_d_in=d_in),
            out_shape=jax.ShapeDtypeStruct((b_p, d_out_p), x.dtype),
            grid=(grid_b,),
            in_specs=in_specs,
            out_specs=pl.BlockSpec((block_b, d_out_p), lambda i: (i, 0)),
            compiler_params=pltpu.CompilerParams(
                dimension_semantics=("parallel",),
                vmem_limit_bytes=vmem_limit),
        )
        return call, args

    call, args = build_call(single_buffer_weights)
    try:
        out = call(*args)
    except Exception:
        if not single_buffer_weights:
            raise
        # Fall back to the default double-buffered weight specs if Buffered(1)
        # is not supported by the installed JAX / lowering path.
        call, args = build_call(False)
        out = call(*args)

    # Strip batch/lane padding (no-op when already aligned).
    return out[:B, :d_out]


def mapper_reference(x, params, *, matmul_dtype=jnp.float32):
    """Pure-JAX reference.  matmul_dtype=bfloat16 mimics the kernel's MXU cast."""
    h = x.astype(jnp.float32)
    h = h * jax.lax.rsqrt(jnp.mean(h * h, axis=-1, keepdims=True) + 1e-8)
    for (w_eff, b_eff) in params:
        y = jnp.dot(h.astype(matmul_dtype), w_eff.astype(matmul_dtype),
                    preferred_element_type=jnp.float32) + b_eff
        h = jnp.where(y >= 0.0, y, 0.2 * y) * (2.0 ** 0.5)
    return h.astype(x.dtype)


if __name__ == "__main__":
    # Small shapes consistent with the module's forward (x is (batch, in_channel)),
    # lane-dense feature dim (128).  batch=16 -> single grid step on every
    # generation (splitting only pays on v7x with >=256-row tiles).
    batch = 16
    in_channel = 128
    out_channel = 128
    num_layers = 4

    key = jax.random.PRNGKey(0)
    key_x, key_p = jax.random.split(key)
    x = jax.random.normal(key_x, (batch, in_channel), dtype=jnp.float32)
    params = init_mapper_params(key_p, in_channel, out_channel, num_layers,
                                lr_mul=0.01)

    # Pack the weights ONCE (pad + transpose + bf16 cast), reuse across calls.
    packed = prepare_mapper_params(params)

    out = jax.block_until_ready(mapper_forward(x, packed))
    assert out.shape == (batch, out_channel)

    # Tight check against a reference with the same bf16-operand / f32-accum
    # matmuls, and a loose check against the pure-f32 reference (bf16 rounding
    # costs ~3 decimal digits per layer).
    ref_bf16 = mapper_reference(x, params, matmul_dtype=jnp.bfloat16)
    ref_f32 = mapper_reference(x, params, matmul_dtype=jnp.float32)
    assert jnp.allclose(out, ref_bf16, atol=2e-3, rtol=2e-3), \
        "mismatch vs bf16-matmul reference"
    assert jnp.allclose(out, ref_f32, atol=5e-2, rtol=5e-2), \
        "drifted too far from f32 reference"

    print("KERNEL_OK")
</pallas_src>

<mosaic_0001>
module attributes {stable_mosaic.version = 11 : i64} {
  func.func @_mapper_kernel(%arg0: i32, %arg1: memref<16x128xf32, #tpu.memory_space<vmem>>, %arg2: memref<128x128xbf16, #tpu.memory_space<vmem>>, %arg3: memref<1x128xf32, #tpu.memory_space<vmem>>, %arg4: memref<128x128xbf16, #tpu.memory_space<vmem>>, %arg5: memref<1x128xf32, #tpu.memory_space<vmem>>, %arg6: memref<128x128xbf16, #tpu.memory_space<vmem>>, %arg7: memref<1x128xf32, #tpu.memory_space<vmem>>, %arg8: memref<128x128xbf16, #tpu.memory_space<vmem>>, %arg9: memref<1x128xf32, #tpu.memory_space<vmem>>, %arg10: memref<16x128xf32, #tpu.memory_space<vmem>>) attributes {dimension_semantics = [#tpu.dimension_semantics<parallel>], iteration_bounds = array<i64: 1>, scalar_prefetch = 0 : i64, scratch_operands = 0 : i64, tpu.core_type = #tpu.core_type<tc>, window_params = [{transform_indices = @transform_0, window_bounds = array<i64: 16, 128>}, {pipeline_mode = #tpu.pipeline_mode<synchronous>, transform_indices = @transform_1, window_bounds = array<i64: 128, 128>}, {pipeline_mode = #tpu.pipeline_mode<synchronous>, transform_indices = @transform_2, window_bounds = array<i64: 1, 128>}, {pipeline_mode = #tpu.pipeline_mode<synchronous>, transform_indices = @transform_3, window_bounds = array<i64: 128, 128>}, {pipeline_mode = #tpu.pipeline_mode<synchronous>, transform_indices = @transform_4, window_bounds = array<i64: 1, 128>}, {pipeline_mode = #tpu.pipeline_mode<synchronous>, transform_indices = @transform_5, window_bounds = array<i64: 128, 128>}, {pipeline_mode = #tpu.pipeline_mode<synchronous>, transform_indices = @transform_6, window_bounds = array<i64: 1, 128>}, {pipeline_mode = #tpu.pipeline_mode<synchronous>, transform_indices = @transform_7, window_bounds = array<i64: 128, 128>}, {pipeline_mode = #tpu.pipeline_mode<synchronous>, transform_indices = @transform_8, window_bounds = array<i64: 1, 128>}, {transform_indices = @transform_9, window_bounds = array<i64: 16, 128>}]} {
    %c0 = arith.constant 0 : index
    %c0_0 = arith.constant 0 : index
    %0 = vector.load %arg1[%c0, %c0_0] : memref<16x128xf32, #tpu.memory_space<vmem>>, vector<16x128xf32>
    %1 = arith.mulf %0, %0 : vector<16x128xf32>
    %cst = arith.constant dense<0.000000e+00> : vector<16xf32>
    %2 = vector.multi_reduction <add>, %1, %cst [1] : vector<16x128xf32> to vector<16xf32>
    %3 = vector.shape_cast %2 : vector<16xf32> to vector<16x1xf32>
    %cst_1 = arith.constant 7.812500e-03 : f32
    %4 = vector.broadcast %cst_1 : f32 to vector<16x1xf32>
    %5 = arith.mulf %3, %4 : vector<16x1xf32>
    %cst_2 = arith.constant 9.99999993E-9 : f32
    %6 = vector.broadcast %cst_2 : f32 to vector<16x1xf32>
    %7 = arith.addf %5, %6 : vector<16x1xf32>
    %8 = math.rsqrt %7 : vector<16x1xf32>
    %9 = vector.broadcast %8 : vector<16x1xf32> to vector<16x128xf32>
    %10 = arith.mulf %0, %9 : vector<16x128xf32>
    %c0_3 = arith.constant 0 : index
    %c0_4 = arith.constant 0 : index
    %11 = vector.load %arg2[%c0_3, %c0_4] : memref<128x128xbf16, #tpu.memory_space<vmem>>, vector<128x128xbf16>
    %c0_5 = arith.constant 0 : index
    %c0_6 = arith.constant 0 : index
    %12 = vector.load %arg3[%c0_5, %c0_6] : memref<1x128xf32, #tpu.memory_space<vmem>>, vector<1x128xf32>
    %13 = arith.truncf %10 : vector<16x128xf32> to vector<16x128xbf16>
    %cst_7 = arith.constant dense<0.000000e+00> : vector<16x128xf32>
    %14 = tpu.matmul %13, %11, %cst_7 {dimension_numbers = #tpu.dot_dimension_numbers<[1], [0], [0], [1], [0, 0, 1, 1], [], []>} : vector<16x128xbf16>, vector<128x128xbf16>, vector<16x128xf32> -> vector<16x128xf32>
    %15 = vector.broadcast %12 : vector<1x128xf32> to vector<16x128xf32>
    %16 = arith.addf %14, %15 : vector<16x128xf32>
    %cst_8 = arith.constant 0.000000e+00 : f32
    %17 = vector.broadcast %cst_8 : f32 to vector<16x128xf32>
    %18 = arith.cmpf oge, %16, %17 : vector<16x128xf32>
    %cst_9 = arith.constant 1.41421354 : f32
    %cst_10 = arith.constant 0.282842726 : f32
    %19 = vector.broadcast %cst_9 : f32 to vector<16x128xf32>
    %20 = vector.broadcast %cst_10 : f32 to vector<16x128xf32>
    %21 = arith.select %18, %19, %20 : vector<16x128xi1>, vector<16x128xf32>
    %22 = arith.mulf %16, %21 : vector<16x128xf32>
    %23 = arith.truncf %22 : vector<16x128xf32> to vector<16x128xbf16>
    %c0_11 = arith.constant 0 : index
    %c0_12 = arith.constant 0 : index
    %24 = vector.load %arg4[%c0_11, %c0_12] : memref<128x128xbf16, #tpu.memory_space<vmem>>, vector<128x128xbf16>
    %c0_13 = arith.constant 0 : index
    %c0_14 = arith.constant 0 : index
    %25 = vector.load %arg5[%c0_13, %c0_14] : memref<1x128xf32, #tpu.memory_space<vmem>>, vector<1x128xf32>
    %cst_15 = arith.constant dense<0.000000e+00> : vector<16x128xf32>
    %26 = tpu.matmul %23, %24, %cst_15 {dimension_numbers = #tpu.dot_dimension_numbers<[1], [0], [0], [1], [0, 0, 1, 1], [], []>} : vector<16x128xbf16>, vector<128x128xbf16>, vector<16x128xf32> -> vector<16x128xf32>
    %27 = vector.broadcast %25 : vector<1x128xf32> to vector<16x128xf32>
    %28 = arith.addf %26, %27 : vector<16x128xf32>
    %cst_16 = arith.constant 0.000000e+00 : f32
    %29 = vector.broadcast %cst_16 : f32 to vector<16x128xf32>
    %30 = arith.cmpf oge, %28, %29 : vector<16x128xf32>
    %cst_17 = arith.constant 1.41421354 : f32
    %cst_18 = arith.constant 0.282842726 : f32
    %31 = vector.broadcast %cst_17 : f32 to vector<16x128xf32>
    %32 = vector.broadcast %cst_18 : f32 to vector<16x128xf32>
    %33 = arith.select %30, %31, %32 : vector<16x128xi1>, vector<16x128xf32>
    %34 = arith.mulf %28, %33 : vector<16x128xf32>
    %35 = arith.truncf %34 : vector<16x128xf32> to vector<16x128xbf16>
    %c0_19 = arith.constant 0 : index
    %c0_20 = arith.constant 0 : index
    %36 = vector.load %arg6[%c0_19, %c0_20] : memref<128x128xbf16, #tpu.memory_space<vmem>>, vector<128x128xbf16>
    %c0_21 = arith.constant 0 : index
    %c0_22 = arith.constant 0 : index
    %37 = vector.load %arg7[%c0_21, %c0_22] : memref<1x128xf32, #tpu.memory_space<vmem>>, vector<1x128xf32>
    %cst_23 = arith.constant dense<0.000000e+00> : vector<16x128xf32>
    %38 = tpu.matmul %35, %36, %cst_23 {dimension_numbers = #tpu.dot_dimension_numbers<[1], [0], [0], [1], [0, 0, 1, 1], [], []>} : vector<16x128xbf16>, vector<128x128xbf16>, vector<16x128xf32> -> vector<16x128xf32>
    %39 = vector.broadcast %37 : vector<1x128xf32> to vector<16x128xf32>
    %40 = arith.addf %38, %39 : vector<16x128xf32>
    %cst_24 = arith.constant 0.000000e+00 : f32
    %41 = vector.broadcast %cst_24 : f32 to vector<16x128xf32>
    %42 = arith.cmpf oge, %40, %41 : vector<16x128xf32>
    %cst_25 = arith.constant 1.41421354 : f32
    %cst_26 = arith.constant 0.282842726 : f32
    %43 = vector.broadcast %cst_25 : f32 to vector<16x128xf32>
    %44 = vector.broadcast %cst_26 : f32 to vector<16x128xf32>
    %45 = arith.select %42, %43, %44 : vector<16x128xi1>, vector<16x128xf32>
    %46 = arith.mulf %40, %45 : vector<16x128xf32>
    %47 = arith.truncf %46 : vector<16x128xf32> to vector<16x128xbf16>
    %c0_27 = arith.constant 0 : index
    %c0_28 = arith.constant 0 : index
    %48 = vector.load %arg8[%c0_27, %c0_28] : memref<128x128xbf16, #tpu.memory_space<vmem>>, vector<128x128xbf16>
    %c0_29 = arith.constant 0 : index
    %c0_30 = arith.constant 0 : index
    %49 = vector.load %arg9[%c0_29, %c0_30] : memref<1x128xf32, #tpu.memory_space<vmem>>, vector<1x128xf32>
    %cst_31 = arith.constant dense<0.000000e+00> : vector<16x128xf32>
    %50 = tpu.matmul %47, %48, %cst_31 {dimension_numbers = #tpu.dot_dimension_numbers<[1], [0], [0], [1], [0, 0, 1, 1], [], []>} : vector<16x128xbf16>, vector<128x128xbf16>, vector<16x128xf32> -> vector<16x128xf32>
    %51 = vector.broadcast %49 : vector<1x128xf32> to vector<16x128xf32>
    %52 = arith.addf %50, %51 : vector<16x128xf32>
    %cst_32 = arith.constant 0.000000e+00 : f32
    %53 = vector.broadcast %cst_32 : f32 to vector<16x128xf32>
    %54 = arith.cmpf oge, %52, %53 : vector<16x128xf32>
    %cst_33 = arith.constant 1.41421354 : f32
    %cst_34 = arith.constant 0.282842726 : f32
    %55 = vector.broadcast %cst_33 : f32 to vector<16x128xf32>
    %56 = vector.broadcast %cst_34 : f32 to vector<16x128xf32>
    %57 = arith.select %54, %55, %56 : vector<16x128xi1>, vector<16x128xf32>
    %58 = arith.mulf %52, %57 : vector<16x128xf32>
    %c0_35 = arith.constant 0 : index
    %c0_36 = arith.constant 0 : index
    %59 = vector.load %arg10[%c0_35, %c0_36] : memref<16x128xf32, #tpu.memory_space<vmem>>, vector<16x128xf32>
    tpu.vector_store %arg10[%c0_35, %c0_36], %58 {strides = array<i32>} : memref<16x128xf32, #tpu.memory_space<vmem>>, vector<16x128xf32>,
    return
  }
  func.func @transform_0(%arg0: i32) -> (i32, i32) {
    %c0_i32 = arith.constant 0 : i32
    %c0_i32_0 = arith.constant 0 : i32
    return %arg0, %c0_i32 : i32, i32
  }
  func.func @transform_1(%arg0: i32) -> (i32, i32) {
    %c0_i32 = arith.constant 0 : i32
    %c0_i32_0 = arith.constant 0 : i32
    %c0_i32_1 = arith.constant 0 : i32
    return %c0_i32, %c0_i32_0 : i32, i32
  }
  func.func @transform_2(%arg0: i32) -> (i32, i32) {
    %c0_i32 = arith.constant 0 : i32
    %c0_i32_0 = arith.constant 0 : i32
    %c0_i32_1 = arith.constant 0 : i32
    return %c0_i32, %c0_i32_0 : i32, i32
  }
  func.func @transform_3(%arg0: i32) -> (i32, i32) {
    %c0_i32 = arith.constant 0 : i32
    %c0_i32_0 = arith.constant 0 : i32
    %c0_i32_1 = arith.constant 0 : i32
    return %c0_i32, %c0_i32_0 : i32, i32
  }
  func.func @transform_4(%arg0: i32) -> (i32, i32) {
    %c0_i32 = arith.constant 0 : i32
    %c0_i32_0 = arith.constant 0 : i32
    %c0_i32_1 = arith.constant 0 : i32
    return %c0_i32, %c0_i32_0 : i32, i32
  }
  func.func @transform_5(%arg0: i32) -> (i32, i32) {
    %c0_i32 = arith.constant 0 : i32
    %c0_i32_0 = arith.constant 0 : i32
    %c0_i32_1 = arith.constant 0 : i32
    return %c0_i32, %c0_i32_0 : i32, i32
  }
  func.func @transform_6(%arg0: i32) -> (i32, i32) {
    %c0_i32 = arith.constant 0 : i32
    %c0_i32_0 = arith.constant 0 : i32
    %c0_i32_1 = arith.constant 0 : i32
    return %c0_i32, %c0_i32_0 : i32, i32
  }
  func.func @transform_7(%arg0: i32) -> (i32, i32) {
    %c0_i32 = arith.constant 0 : i32
    %c0_i32_0 = arith.constant 0 : i32
    %c0_i32_1 = arith.constant 0 : i32
    return %c0_i32, %c0_i32_0 : i32, i32
  }
  func.func @transform_8(%arg0: i32) -> (i32, i32) {
    %c0_i32 = arith.constant 0 : i32
    %c0_i32_0 = arith.constant 0 : i32
    %c0_i32_1 = arith.constant 0 : i32
    return %c0_i32, %c0_i32_0 : i32, i32
  }
  func.func @transform_9(%arg0: i32) -> (i32, i32) {
    %c0_i32 = arith.constant 0 : i32
    %c0_i32_0 = arith.constant 0 : i32
    return %arg0, %c0_i32 : i32, i32
  }
}

</mosaic_0001>

<bundles_post_ra>
// kernel: tpu_custom_call.1
= control target key start
LH: loop header
LB: loop body
LE: loop exit
PB: predicated region body
PF: predicated region fallthrough
CT: control target
= control target key end

     0   :  { %14 = vsyncpa [#allocation3], 0  ;;  %s1169_s0 = inlined_call_operand.hbm [shape: f32[16,128], index: 0, kind: input, shape index: {}]   ;;  %s1170_s1 = inlined_call_operand.hbm [shape: bf16[128,128], index: 1, kind: input, shape index: {}]   ;;  %s1171_s2 = inlined_call_operand.vmem [shape: f32[1,128], index: 2, kind: input, shape index: {}]   ;;  %s1172_s3 = inlined_call_operand.hbm [shape: bf16[128,128], index: 3, kind: input, shape index: {}]   ;;  %s1173_s4 = inlined_call_operand.vmem [shape: f32[1,128], index: 4, kind: input, shape index: {}]   ;;  %s1174_s5 = inlined_call_operand.hbm [shape: bf16[128,128], index: 5, kind: input, shape index: {}]   ;;  %s1175_s6 = inlined_call_operand.vmem [shape: f32[1,128], index: 6, kind: input, shape index: {}]   ;;  %s1176_s7 = inlined_call_operand.hbm [shape: bf16[128,128], index: 7, kind: input, shape index: {}]   ;;  %s1177_s8 = inlined_call_operand.vmem [shape: f32[1,128], index: 8, kind: input, shape index: {}]   ;;  %s1178_s9 = inlined_call_operand.hbm [shape: f32[16,128], index: 9, kind: output, shape index: {}]  }
   0x1   :  { %15 = vsyncpa [#allocation6], 0 }
   0x2   :  { %16 = vsyncpa [#allocation9], 0 }
   0x3   :  { %17 = vsyncpa [#allocation4], 0  ;;  %s956_s30 = smov [#allocation5]   ;;  %s816_s13 = scalar_lea.hbm %s1170_s1, 1024 }
   0x4   :  { %s35_s10 = sshll.u32 %s956_s30, 4  ;;  %p817_p0 = scmp.ne.s32.totalorder %s1170_s1, %s816_s13  ;;  %s36_s10 = int_to_ptr.vmem [resolvable:$true] %s35_s10 }
   0x5   :  { %p820_p1 = scmp.lt.u32.totalorder %s816_s13, %s1170_s1 }
   0x7   :  { %p822_p2 = pnand %p820_p1, %p817_p0 }
   0x9   :  { %825 = shalt.err (!%p822_p2)
}
   0xa   :  { %s826_s18 = scalar_lea.vmem %s36_s10, 1024  ;;  %p831_p4 = scmp.lt.s32.totalorder %s36_s10, %s36_s10 }
   0xb   :  { %p827_p3 = scmp.ne.s32.totalorder %s36_s10, %s826_s18  ;;  %p832_p5 = scmp.lt.s32.totalorder %s826_s18, %s826_s18 }
   0xd   :  { %p833_p6 = por %p832_p5, %p831_p4 }
   0xf   :  { %p834_p7 = pnand %p833_p6, %p827_p3 }
  0x11   :  { %837 = shalt.err (!%p834_p7)
}
  0x12   :  { %s957_s19 = smov 64   ;;  %s958_s20 = smov 4  }
  0x13   :  { %41 = dma.hbm_to_vmem [thread:$0]  %s1170_s1, 1024, %s36_s10, [#allocation6], %s957_s19, %s957_s19, %s958_s20  }
  0x14   :  { %s959_s23 = smov [#allocation8]   ;;  %s960_s25 = smov [#allocation2]  }
  0x15   :  { %s63_s24 = sshll.u32 %s959_s23, 4  ;;  %s23_s26 = sshll.u32 %s960_s25, 4  ;;  %s64_s24 = int_to_ptr.vmem [resolvable:$true] %s63_s24  ;;  %s24_s26 = int_to_ptr.vmem [resolvable:$true] %s23_s26 }
  0x16   :  { %s838_s29 = scalar_lea.hbm %s1174_s5, 1024 }
  0x17   :  { %p839_p8 = scmp.ne.s32.totalorder %s1174_s5, %s838_s29  ;;  %p842_p9 = scmp.lt.u32.totalorder %s838_s29, %s1174_s5 }
  0x19   :  { %p844_p10 = pnand %p842_p9, %p839_p8 }
  0x1b   :  { %847 = shalt.err (!%p844_p10)
}
  0x1c   :  { %s848_s1 = scalar_lea.vmem %s64_s24, 1024  ;;  %p853_p12 = scmp.lt.s32.totalorder %s64_s24, %s64_s24 }
  0x1d   :  { %p849_p11 = scmp.ne.s32.totalorder %s64_s24, %s848_s1  ;;  %p854_p13 = scmp.lt.s32.totalorder %s848_s1, %s848_s1 }
  0x1f   :  { %p855_p0 = por %p854_p13, %p853_p12 }
  0x21   :  { %p856_p1 = pnand %p855_p0, %p849_p11 }
  0x23   :  { %859 = shalt.err (!%p856_p1)
}
  0x24   :  { %69 = dma.hbm_to_vmem [thread:$0]  %s1174_s5, 1024, %s64_s24, [#allocation9], %s957_s19, %s957_s19, %s958_s20  }
  0x25   :  { %s860_s17 = scalar_lea.hbm %s1169_s0, 256 }
  0x26   :  { %p861_p2 = scmp.ne.s32.totalorder %s1169_s0, %s860_s17  ;;  %p864_p3 = scmp.lt.u32.totalorder %s860_s17, %s1169_s0 }
  0x28   :  { %p866_p4 = pnand %p864_p3, %p861_p2 }
  0x2a   :  { %869 = shalt.err (!%p866_p4)
}
  0x2b   :  { %s870_s25 = scalar_lea.vmem %s24_s26, 256  ;;  %p875_p6 = scmp.lt.s32.totalorder %s24_s26, %s24_s26 }
  0x2c   :  { %p871_p5 = scmp.ne.s32.totalorder %s24_s26, %s870_s25  ;;  %p876_p7 = scmp.lt.s32.totalorder %s870_s25, %s870_s25 }
  0x2e   :  { %p877_p8 = por %p876_p7, %p875_p6 }
  0x30   :  { %p878_p9 = pnand %p877_p8, %p871_p5 }
  0x32   :  { %881 = shalt.err (!%p878_p9)
}
  0x33   :  { %s961_s5 = smov 128   ;;  %s962_s24 = smov 8  }
  0x34   :  { %29 = dma.hbm_to_vmem [thread:$0]  %s1169_s0, 256, %s24_s26, [#allocation3], %s961_s5, %s961_s5, %s962_s24  }
  0x35   :  { %s963_s29 = smov [#allocation7]   ;;  %s964_s11 = smov [#allocation10]  }
  0x36   :  { %s49_s30 = sshll.u32 %s963_s29, 4  ;;  %s77_s12 = sshll.u32 %s964_s11, 4  ;;  %s50_s30 = int_to_ptr.vmem [resolvable:$true] %s49_s30  ;;  %s78_s12 = int_to_ptr.vmem [resolvable:$true] %s77_s12 }
  0x37   :  { %s882_s10 = scalar_lea.hbm %s1172_s3, 1024 }
  0x38   :  { %p883_p10 = scmp.ne.s32.totalorder %s1172_s3, %s882_s10  ;;  %p886_p11 = scmp.lt.u32.totalorder %s882_s10, %s1172_s3 }
  0x3a   :  { %p888_p12 = pnand %p886_p11, %p883_p10 }
  0x3c   :  { %891 = shalt.err (!%p888_p12)
}
  0x3d   :  { %s892_s0 = scalar_lea.vmem %s50_s30, 1024  ;;  %p897_p0 = scmp.lt.s32.totalorder %s50_s30, %s50_s30 }
  0x3e   :  { %p893_p13 = scmp.ne.s32.totalorder %s50_s30, %s892_s0  ;;  %p898_p1 = scmp.lt.s32.totalorder %s892_s0, %s892_s0 }
  0x40   :  { %p899_p2 = por %p898_p1, %p897_p0 }
  0x42   :  { %p900_p3 = pnand %p899_p2, %p893_p13 }
  0x44   :  { %903 = shalt.err (!%p900_p3)
}
  0x45   :  { %55 = dma.hbm_to_vmem [thread:$0]  %s1172_s3, 1024, %s50_s30, [#allocation6], %s957_s19, %s957_s19, %s958_s20  }
  0x46   :  { %s904_s23 = scalar_lea.hbm %s1176_s7, 1024 }
  0x47   :  { %p905_p4 = scmp.ne.s32.totalorder %s1176_s7, %s904_s23  ;;  %p908_p5 = scmp.lt.u32.totalorder %s904_s23, %s1176_s7 }
  0x49   :  { %p910_p6 = pnand %p908_p5, %p905_p4 }
  0x4b   :  { %913 = shalt.err (!%p910_p6)
}
  0x4c   :  { %s914_s11 = scalar_lea.vmem %s78_s12, 1024  ;;  %p919_p8 = scmp.lt.s32.totalorder %s78_s12, %s78_s12 }
  0x4d   :  { %p915_p7 = scmp.ne.s32.totalorder %s78_s12, %s914_s11  ;;  %p920_p9 = scmp.lt.s32.totalorder %s914_s11, %s914_s11 }
  0x4f   :  { %p921_p10 = por %p920_p9, %p919_p8 }
  0x51   :  { %p922_p11 = pnand %p921_p10, %p915_p7 }
  0x53   :  { %925 = shalt.err (!%p922_p11)
}
  0x54   :  { %83 = dma.hbm_to_vmem [thread:$0]  %s1176_s7, 1024, %s78_s12, [#allocation9], %s957_s19, %s957_s19, %s958_s20  }
  0x55   :  { %948 = dma.done.wait [#allocation3], 256  }
  0x56   :  { %949 = vsyncadd [#allocation3], 4294967040 }
  0x57   :  { %950 = dma.done.wait [#allocation6], 2048  }
  0x58   :  { %951 = vsyncadd [#allocation6], 4294965248 }
  0x59   :  { %952 = dma.done.wait [#allocation9], 2048  }
  0x5a   :  { %953 = vsyncadd [#allocation9], 4294965248  ;;  %v965_v0 = vmov 0.0   ;;  %v102_v1 = vld [vmem:[#allocation2] sm:$0xff]  ;;  %v103_v2 = vld [vmem:[#allocation2 + $0x8] sm:$0xff]  ;;  %vm966_vm0 = vmmov 0  }
  0x5b   :  { %687 = vmatprep.subr.bf16.mxu0 %v965_v0  ;;  %707 = vmatprep.subr.bf16.mxu1 %v965_v0  ;;  %v104_v3 = vmul.f32 %v102_v1, %v102_v1  ;;  %v780_v4 = vld [vmem:[#allocation5] sm:$0xff]   ;;  %v781_v5 = vld [vmem:[#allocation5 + $0x8] sm:$0xff]   ;;  %v105_v6 = vmul.f32 %v103_v2, %v103_v2  ;;  %v782_v7 = vld [vmem:[#allocation5 + $0x10] sm:$0xff]   ;;  %v967_v44 = vmov 0.28284273  }
  0x5c   :  { %688 = vmatpush3.bf16.msra.mxu0 %v780_v4  ;;  %v783_v8 = vld [vmem:[#allocation5 + $0x18] sm:$0xff]   ;;  %v784_v9 = vld [vmem:[#allocation5 + $0x20] sm:$0xff]   ;;  %v785_v10 = vld [vmem:[#allocation5 + $0x28] sm:$0xff]   ;;  %703 = vmatprep.mubr.msk.bf16.mxu0 %vm966_vm0, %v965_v0 }
  0x5d   :  { %106 = vadd.xlane.f32.xlu0 %v104_v3  ;;  %689 = vmatprep.subr.bf16.mxu0 %v965_v0  ;;  %v786_v11 = vld [vmem:[#allocation5 + $0x30] sm:$0xff]   ;;  %v787_v12 = vld [vmem:[#allocation5 + $0x38] sm:$0xff]   ;;  %v788_v13 = vld [vmem:[#allocation7] sm:$0xff]  }
  0x5e   :  { %723 = vmatprep.mubr.msk.bf16.mxu1 %vm966_vm0, %v965_v0  ;;  %708 = vmatpush3.bf16.msra.mxu1 %v788_v13  ;;  %v789_v14 = vld [vmem:[#allocation7 + $0x8] sm:$0xff]   ;;  %v790_v15 = vld [vmem:[#allocation7 + $0x10] sm:$0xff]   ;;  %v791_v16 = vld [vmem:[#allocation7 + $0x18] sm:$0xff]  }
  0x5f   :  { %709 = vmatprep.subr.bf16.mxu1 %v965_v0  ;;  %v792_v17 = vld [vmem:[#allocation7 + $0x20] sm:$0xff]   ;;  %v793_v29 = vld [vmem:[#allocation7 + $0x28] sm:$0xff]   ;;  %v794_v30 = vld [vmem:[#allocation7 + $0x30] sm:$0xff]  }
  0x60   :  { %690 = vmatpush3.bf16.msra.mxu0 %v781_v5  ;;  %v795_v31 = vld [vmem:[#allocation7 + $0x38] sm:$0xff]   ;;  %v796_v32 = vld [vmem:[#allocation8] sm:$0xff]   ;;  %v797_v33 = vld [vmem:[#allocation8 + $0x8] sm:$0xff]  }
  0x61   :  { %108 = vadd.xlane.f32.xlu0 %v105_v6  ;;  %691 = vmatprep.subr.bf16.mxu0 %v965_v0  ;;  %v798_v34 = vld [vmem:[#allocation8 + $0x10] sm:$0xff]   ;;  %v799_v35 = vld [vmem:[#allocation8 + $0x18] sm:$0xff]   ;;  %v800_v36 = vld [vmem:[#allocation8 + $0x20] sm:$0xff]  }
  0x62   :  { %710 = vmatpush3.bf16.msra.mxu1 %v789_v14  ;;  %v615_v37 = vld [vmem:[%s1171_s2] ss:$0 sm:$0xff]  ;;  %v801_v50 = vld [vmem:[#allocation8 + $0x28] sm:$0xff]   ;;  %v803_v52 = vld [vmem:[#allocation8 + $0x38] sm:$0xff]  }
  0x63   :  { %711 = vmatprep.subr.bf16.mxu1 %v965_v0  ;;  %v802_v51 = vld [vmem:[#allocation8 + $0x30] sm:$0xff]   ;;  %v804_v53 = vld [vmem:[#allocation10] sm:$0xff]   ;;  %v805_v54 = vld [vmem:[#allocation10 + $0x8] sm:$0xff]  }
  0x64   :  { %692 = vmatpush3.bf16.msra.mxu0 %v782_v7  ;;  %v806_v55 = vld [vmem:[#allocation10 + $0x10] sm:$0xff]   ;;  %v807_v56 = vld [vmem:[#allocation10 + $0x18] sm:$0xff]   ;;  %v808_v57 = vld [vmem:[#allocation10 + $0x20] sm:$0xff]  }
  0x65   :  { %693 = vmatprep.subr.bf16.mxu0 %v965_v0  ;;  %v624_v58 = vld [vmem:[%s1173_s4] ss:$0 sm:$0xff]  ;;  %v809_v7 = vld [vmem:[#allocation10 + $0x28] sm:$0xff]  }
  0x66   :  { %712 = vmatpush3.bf16.msra.mxu1 %v790_v15 }
  0x67   :  { %713 = vmatprep.subr.bf16.mxu1 %v965_v0 }
  0x68   :  { %694 = vmatpush3.bf16.msra.mxu0 %v783_v8  ;;  %v810_v8 = vld [vmem:[#allocation10 + $0x30] sm:$0xff]  }
  0x69   :  { %695 = vmatprep.subr.bf16.mxu0 %v965_v0 }
  0x6a   :  { %714 = vmatpush3.bf16.msra.mxu1 %v791_v16 }
  0x6b   :  { %715 = vmatprep.subr.bf16.mxu1 %v965_v0 }
  0x6c   :  { %696 = vmatpush3.bf16.msra.mxu0 %v784_v9  ;;  %v811_v9 = vld [vmem:[#allocation10 + $0x38] sm:$0xff]  }
  0x6d   :  { %697 = vmatprep.subr.bf16.mxu0 %v965_v0 }
  0x6e   :  { %716 = vmatpush3.bf16.msra.mxu1 %v792_v17 }
  0x6f   :  { %717 = vmatprep.subr.bf16.mxu1 %v965_v0 }
  0x70   :  { %698 = vmatpush3.bf16.msra.mxu0 %v785_v10  ;;  %v633_v10 = vld [vmem:[%s1175_s6] ss:$0 sm:$0xff]  ;;  %s968_s6 = smov [#allocation11]  }
  0x71   :  { %699 = vmatprep.subr.bf16.mxu0 %v965_v0  ;;  %s601_s10 = sshll.u32 %s968_s6, 4  ;;  %s602_s10 = int_to_ptr.vmem [resolvable:$true] %s601_s10 }
  0x72   :  { %718 = vmatpush3.bf16.msra.mxu1 %v793_v29  ;;  %p931_p13 = scmp.lt.s32.totalorder %s602_s10, %s602_s10 }
  0x73   :  { %719 = vmatprep.subr.bf16.mxu1 %v965_v0 }
  0x74   :  { %700 = vmatpush3.bf16.msra.mxu0 %v786_v11 }
  0x75   :  { %701 = vmatprep.subr.bf16.mxu0 %v965_v0 }
  0x76   :  { %720 = vmatpush3.bf16.msra.mxu1 %v794_v30 }
  0x77   :  { %721 = vmatprep.subr.bf16.mxu1 %v965_v0 }
  0x78   :  { %702 = vmatpush3.bf16.msra.mxu0 %v787_v12 }
  0x79   :  { %727 = vmatprep.subr.bf16.mxu0 %v965_v0 }
  0x7a   :  { %722 = vmatpush3.bf16.msra.mxu1 %v795_v31 }
  0x7b   :  { %747 = vmatprep.subr.bf16.mxu1 %v965_v0 }
  0xea   :  { %v107_v18 = vpop.xlane.xlu0 %106 }
  0xeb   :  { %v110_v19 = vmul.f32 0.0078125, %v107_v18 }
  0xed   :  { %v112_v20 = vadd.f32 1e-08, %v110_v19 }
  0xee   :  { %v109_v21 = vpop.xlane.xlu0 %108 }
  0xef   :  { %v111_v22 = vmul.f32 0.0078125, %v109_v21  ;;  %812 = vrsqrt.f32 %v112_v20  ;;  %v642_v21 = vld [vmem:[%s1177_s8] ss:$0 sm:$0xff]  ;;  %s926_s8 = scalar_lea.vmem %s602_s10, 256 }
  0xf0   :  { %p927_p12 = scmp.ne.s32.totalorder %s602_s10, %s926_s8  ;;  %p932_p0 = scmp.lt.s32.totalorder %s926_s8, %s926_s8 }
  0xf1   :  { %v113_v23 = vadd.f32 1e-08, %v111_v22 }
  0xf2   :  { %p933_p1 = por %p932_p0, %p931_p13 }
  0xf3   :  { %814 = vrsqrt.f32 %v113_v23 }
  0xf4   :  { %p934_p2 = pnand %p933_p1, %p927_p12 }
  0xf9   :  { %v813_v24 = vpop.eup %812 }
  0xfa   :  { %v116_v26 = vmul.f32 %v813_v24, %v102_v1 }
  0xfd   :  { %v815_v25 = vpop.eup %814 }
  0xfe   :  { %v117_v27 = vmul.f32 %v815_v25, %v103_v2 }
 0x100   :  { %v135_v28 = vpack.c.bf16 %v117_v27, %v116_v26 }
 0x102   :  { %704 = vmatmul.mubr.bf16.vlgmr.msra.gmra.mrb[0].mxu0 %v135_v28 }
 0x103   :  { %743 = vmatprep.mubr.msk.bf16.mxu0 %vm966_vm0, %v965_v0  ;;  %728 = vmatpush3.bf16.msra.mxu0 %v796_v32 }
 0x104   :  { %729 = vmatprep.subr.bf16.mxu0 %v965_v0 }
 0x107   :  { %730 = vmatpush3.bf16.msra.mxu0 %v797_v33 }
 0x108   :  { %731 = vmatprep.subr.bf16.mxu0 %v965_v0 }
 0x10b   :  { %732 = vmatpush3.bf16.msra.mxu0 %v798_v34 }
 0x10c   :  { %733 = vmatprep.subr.bf16.mxu0 %v965_v0 }
 0x10f   :  { %734 = vmatpush3.bf16.msra.mxu0 %v799_v35 }
 0x110   :  { %735 = vmatprep.subr.bf16.mxu0 %v965_v0 }
 0x113   :  { %736 = vmatpush3.bf16.msra.mxu0 %v800_v36 }
 0x114   :  { %737 = vmatprep.subr.bf16.mxu0 %v965_v0 }
 0x117   :  { %738 = vmatpush3.bf16.msra.mxu0 %v801_v50 }
 0x118   :  { %739 = vmatprep.subr.bf16.mxu0 %v965_v0 }
 0x11b   :  { %740 = vmatpush3.bf16.msra.mxu0 %v802_v51 }
 0x11c   :  { %741 = vmatprep.subr.bf16.mxu0 %v965_v0 }
 0x11f   :  { %742 = vmatpush3.bf16.msra.mxu0 %v803_v52 }
 0x1d5   :  { %v224_v38 = vpop.f32.mrb[0].mxu0 }
 0x1d6   :  { %v225_v39 = vadd.f32 %v615_v37, %v224_v38  ;;  %v705_v40 = vpop.f32.mrb[1].mxu0 }
 0x1d7   :  { %v227_v41 = vpop.f32.mrb[2].mxu0 }
 0x1d8   :  { %vm231_vm1 = vcmp.ge.f32.partialorder %v225_v39, 0.0  ;;  %v228_v42 = vadd.f32 %v615_v37, %v227_v41  ;;  %v706_v43 = vpop.f32.mrb[3].mxu0 }
 0x1d9   :  { %v233_v45 = vsel %vm231_vm1, 1.4142135, %v967_v44 }
 0x1da   :  { %vm232_vm2 = vcmp.ge.f32.partialorder %v228_v42, 0.0  ;;  %v235_v47 = vmul.f32 %v233_v45, %v225_v39 }
 0x1db   :  { %v234_v46 = vsel %vm232_vm2, 1.4142135, %v967_v44 }
 0x1dc   :  { %v236_v48 = vmul.f32 %v234_v46, %v228_v42 }
 0x1de   :  { %v237_v49 = vpack.c.bf16 %v236_v48, %v235_v47 }
 0x1e0   :  { %724 = vmatmul.mubr.bf16.vlgmr.msra.gmra.mrb[0].mxu1 %v237_v49 }
 0x1e1   :  { %763 = vmatprep.mubr.msk.bf16.mxu1 %vm966_vm0, %v965_v0  ;;  %748 = vmatpush3.bf16.msra.mxu1 %v804_v53 }
 0x1e2   :  { %749 = vmatprep.subr.bf16.mxu1 %v965_v0 }
 0x1e5   :  { %750 = vmatpush3.bf16.msra.mxu1 %v805_v54 }
 0x1e6   :  { %751 = vmatprep.subr.bf16.mxu1 %v965_v0 }
 0x1e9   :  { %752 = vmatpush3.bf16.msra.mxu1 %v806_v55 }
 0x1ea   :  { %753 = vmatprep.subr.bf16.mxu1 %v965_v0 }
 0x1ed   :  { %754 = vmatpush3.bf16.msra.mxu1 %v807_v56 }
 0x1ee   :  { %755 = vmatprep.subr.bf16.mxu1 %v965_v0 }
 0x1f1   :  { %756 = vmatpush3.bf16.msra.mxu1 %v808_v57 }
 0x1f2   :  { %757 = vmatprep.subr.bf16.mxu1 %v965_v0 }
 0x1f5   :  { %758 = vmatpush3.bf16.msra.mxu1 %v809_v7 }
 0x1f6   :  { %759 = vmatprep.subr.bf16.mxu1 %v965_v0 }
 0x1f9   :  { %760 = vmatpush3.bf16.msra.mxu1 %v810_v8 }
 0x1fa   :  { %761 = vmatprep.subr.bf16.mxu1 %v965_v0 }
 0x1fd   :  { %762 = vmatpush3.bf16.msra.mxu1 %v811_v9 }
 0x2b3   :  { %v343_v59 = vpop.f32.mrb[0].mxu1 }
 0x2b4   :  { %v344_v60 = vadd.f32 %v624_v58, %v343_v59  ;;  %v725_v61 = vpop.f32.mrb[1].mxu1 }
 0x2b5   :  { %v346_v62 = vpop.f32.mrb[2].mxu1 }
 0x2b6   :  { %vm350_vm3 = vcmp.ge.f32.partialorder %v344_v60, 0.0  ;;  %v347_v63 = vadd.f32 %v624_v58, %v346_v62  ;;  %v726_v1 = vpop.f32.mrb[3].mxu1 }
 0x2b7   :  { %v352_v2 = vsel %vm350_vm3, 1.4142135, %v967_v44 }
 0x2b8   :  { %vm351_vm4 = vcmp.ge.f32.partialorder %v347_v63, 0.0  ;;  %v354_v4 = vmul.f32 %v352_v2, %v344_v60 }
 0x2b9   :  { %v353_v3 = vsel %vm351_vm4, 1.4142135, %v967_v44 }
 0x2ba   :  { %v355_v5 = vmul.f32 %v353_v3, %v347_v63 }
 0x2bc   :  { %v356_v6 = vpack.c.bf16 %v355_v5, %v354_v4 }
 0x2be   :  { %744 = vmatmul.mubr.bf16.vlgmr.msra.gmra.mrb[4].mxu0 %v356_v6 }
 0x391   :  { %v462_v11 = vpop.f32.mrb[4].mxu0 }
 0x392   :  { %v463_v12 = vadd.f32 %v633_v10, %v462_v11  ;;  %v745_v13 = vpop.f32.mrb[5].mxu0 }
 0x393   :  { %v465_v14 = vpop.f32.mrb[6].mxu0 }
 0x394   :  { %vm469_vm5 = vcmp.ge.f32.partialorder %v463_v12, 0.0  ;;  %v466_v15 = vadd.f32 %v633_v10, %v465_v14  ;;  %v746_v16 = vpop.f32.mrb[7].mxu0 }
 0x395   :  { %v471_v17 = vsel %vm469_vm5, 1.4142135, %v967_v44 }
 0x396   :  { %vm470_vm6 = vcmp.ge.f32.partialorder %v466_v15, 0.0  ;;  %v473_v19 = vmul.f32 %v471_v17, %v463_v12 }
 0x397   :  { %v472_v18 = vsel %vm470_vm6, 1.4142135, %v967_v44 }
 0x398   :  { %v474_v0 = vmul.f32 %v472_v18, %v466_v15 }
 0x39a   :  { %v475_v20 = vpack.c.bf16 %v474_v0, %v473_v19 }
 0x39c   :  { %764 = vmatmul.mubr.bf16.vlgmr.msra.gmra.mrb[4].mxu1 %v475_v20 }
 0x46f   :  { %v581_v22 = vpop.f32.mrb[4].mxu1 }
 0x470   :  { %v582_v23 = vadd.f32 %v642_v21, %v581_v22  ;;  %v765_v24 = vpop.f32.mrb[5].mxu1 }
 0x471   :  { %v584_v25 = vpop.f32.mrb[6].mxu1 }
 0x472   :  { %vm588_vm7 = vcmp.ge.f32.partialorder %v582_v23, 0.0  ;;  %v585_v26 = vadd.f32 %v642_v21, %v584_v25  ;;  %v766_v27 = vpop.f32.mrb[7].mxu1 }
 0x473   :  { %v590_v28 = vsel %vm588_vm7, 1.4142135, %v967_v44 }
 0x474   :  { %v592_v29 = vmul.f32 %v590_v28, %v582_v23  ;;  %vm589_vm8 = vcmp.ge.f32.partialorder %v585_v26, 0.0 }
 0x475   :  { %v591_v30 = vsel %vm589_vm8, 1.4142135, %v967_v44 }
 0x476   :  { %594 = vst [vmem:[#allocation11] sm:$0xff] %v592_v29  ;;  %v593_v31 = vmul.f32 %v591_v30, %v585_v26 }
 0x478   :  { %595 = vst [vmem:[#allocation11 + $0x8] sm:$0xff] %v593_v31 }
 0x479   :  { %937 = shalt.err (!%p934_p2)
}
 0x47a   :  { %s938_s16 = scalar_lea.hbm %s1178_s9, 256 }
 0x47b   :  { %p939_p3 = scmp.ne.s32.totalorder %s1178_s9, %s938_s16  ;;  %p942_p4 = scmp.lt.u32.totalorder %s938_s16, %s1178_s9 }
 0x47d   :  { %p944_p5 = pnand %p942_p4, %p939_p3 }
 0x47f   :  { %947 = shalt.err (!%p944_p5)
}
 0x480   :  { %607 = dma.vmem_to_hbm [thread:$0]  %s602_s10, 256, %s1178_s9, [#allocation4], %s961_s5, %s961_s5, %s962_s24  }
 0x481   :  { %954 = dma.done.wait [#allocation4], 256  }
 0x482   :  { %955 = vsyncadd [#allocation4], 4294967040 }
 0x483   :  { %611 = vsyncpa [#allocation3], 1 }
 0x484   :  { %612 = vsyncpa [#allocation6], 1 }
 0x485   :  { %613 = vsyncpa [#allocation9], 1 }
 0x486   :  { %614 = vsyncpa [#allocation4], 1 }

</bundles_post_ra>
